<compile_context>
chip_gen: v5e
topology: v5e:2x2
jax: 0.10.0
libtpu: 0.0.40
codegen_flags: <defaults>
</compile_context>

<pallas_src>
import jax
import jax.numpy as jnp
from jax.experimental import pallas as pl
from jax.experimental.pallas import tpu as pltpu


# --------------------------------------------------------------------------
# Kernel 1: sigmoid + mean over points, streamed over batch tiles.
# --------------------------------------------------------------------------
def sigmoid_mean_kernel(y_ref, out_ref):
    # y_ref:   (tb, P, F)  dsc activation block in its native layout (bf16/f32)
    # out_ref: (tb, 1, F)  f32 per-sample mean over the P points
    P = y_ref.shape[1]
    y = y_ref[...].astype(jnp.float32)            # upcast once; f32 math below
    # sigmoid(x) == 0.5*tanh(0.5*x) + 0.5 : single EUP op per element; the
    # mul/add ride the 4-wide VALU which has slack.
    sig = 0.5 * jnp.tanh(0.5 * y) + 0.5           # (tb, P, F)
    # Mean over points: sublane-axis reduce; scale the tiny result by 1/P
    # instead of the big tensor.
    out_ref[...] = jnp.sum(sig, axis=1, keepdims=True) * (1.0 / float(P))


# --------------------------------------------------------------------------
# Kernel 2: Linear -> ELU -> Linear -> LogSoftmax on the whole batch at once.
# --------------------------------------------------------------------------
def head_kernel(ym_ref, w1_ref, b1_ref, w2_ref, b2_ref, out_ref):
    # ym_ref:  (B, F)   f32 per-sample means
    # w1_ref:  (F, H),  b1_ref: (1, H)
    # w2_ref:  (H, 128) class dim zero-padded,  b2_ref: (1, 128) -1e30 padded
    # out_ref: (B, 128) log-probabilities (valid in the first C columns)
    h = jnp.dot(ym_ref[...], w1_ref[...], preferred_element_type=jnp.float32)
    h = h + b1_ref[...]

    # ELU (alpha=1).  For h <= 0:  expm1(h) == 2*t/(1-t) with t = tanh(h/2);
    # exact (no exp(h)-1 cancellation near 0) and t in (-1, 0] so 1-t >= 1.
    hn = jnp.minimum(h, 0.0)
    t = jnp.tanh(0.5 * hn)
    h = jnp.where(h > 0.0, h, 2.0 * t / (1.0 - t))

    logits = jnp.dot(h, w2_ref[...], preferred_element_type=jnp.float32)
    logits = logits + b2_ref[...]                 # padded cols carry -1e30

    # LogSoftmax over lanes; exp(-1e30 - m) underflows to exactly 0 in f32,
    # so the padded columns never perturb the log-sum-exp.
    m = jnp.max(logits, axis=-1, keepdims=True)
    lse = jnp.log(jnp.sum(jnp.exp(logits - m), axis=-1, keepdims=True)) + m
    out_ref[...] = logits - lse                   # dense (B, 128) store


# --------------------------------------------------------------------------
# Wrapper
# --------------------------------------------------------------------------
def net_head(y_dsc, w1, b1, w2, b2, *, tb=None):
    """y_dsc: (B, P, F) dsc output in its native layout (bf16 or f32;
    torch keeps it flattened as (B*P, F)).  Returns (B, C) f32 log-probs."""
    B, P, F = y_dsc.shape
    H = w1.shape[1]
    C = w2.shape[1]
    Cp = 128                                      # lane-dense padded class dim

    if tb is None:
        tb = B if B < 8 else 8                    # production: multiple of 8
    assert B % tb == 0, "batch tile must divide the batch"

    # --- Kernel 1: gridded + pipelined over batch tiles (no transpose) ------
    y_mean3 = pl.pallas_call(
        sigmoid_mean_kernel,
        out_shape=jax.ShapeDtypeStruct((B, 1, F), jnp.float32),
        grid=(B // tb,),
        in_specs=[pl.BlockSpec((tb, P, F), lambda i: (i, 0, 0))],
        out_specs=pl.BlockSpec((tb, 1, F), lambda i: (i, 0, 0)),
        compiler_params=pltpu.CompilerParams(
            dimension_semantics=("parallel",)),
    )(y_dsc)
    y_mean = y_mean3.reshape(B, F)                # tiny (B, F) intermediate

    # --- Tiny one-time parameter plumbing (all small) ------------------------
    b1_2d = b1.reshape(1, H).astype(jnp.float32)
    w2_p = jnp.zeros((H, Cp), jnp.float32).at[:, :C].set(w2.astype(jnp.float32))
    b2_p = jnp.full((1, Cp), -1e30, jnp.float32).at[0, :C].set(
        b2.astype(jnp.float32))

    # --- Kernel 2: whole-batch head, single block, weights loaded once ------
    out_padded = pl.pallas_call(
        head_kernel,
        out_shape=jax.ShapeDtypeStruct((B, Cp), jnp.float32),
        in_specs=[pl.BlockSpec(memory_space=pltpu.MemorySpace.VMEM)] * 5,
        out_specs=pl.BlockSpec(memory_space=pltpu.MemorySpace.VMEM),
    )(y_mean, w1.astype(jnp.float32), b1_2d, w2_p, b2_p)

    return out_padded[:, :C]


def net_head_ref(y_dsc, w1, b1, w2, b2):
    """Pure-JAX reference mirroring the PyTorch forward tail."""
    y = jax.nn.sigmoid(y_dsc.astype(jnp.float32))
    y = jnp.mean(y, axis=1)
    h = jax.nn.elu(y @ w1 + b1)
    logits = h @ w2 + b2
    return jax.nn.log_softmax(logits, axis=1)


if __name__ == "__main__":
    # Small shapes consistent with the module's forward:
    #   batch=2, nr_points=8 (stand-in for 1000), filter_nr=15,
    #   hidden=32 (stand-in for 256), nr_clases=10
    B, P, F, H, C = 2, 8, 15, 32, 10

    key = jax.random.PRNGKey(0)
    k_y, k_w1, k_b1, k_w2, k_b2 = jax.random.split(key, 5)

    # Deterministic stand-in for the DirectionalSplineConvNoF output, streamed
    # in bf16 (halves HBM/VMEM traffic of the only large tensor); the kernel
    # upcasts to f32 internally.
    y_dsc = jax.random.normal(k_y, (B, P, F), dtype=jnp.float32).astype(
        jnp.bfloat16)

    # Parameter init (shapes from Linear(filter_nr, 256), Linear(256, nr_clases)).
    w1 = jax.random.normal(k_w1, (F, H), dtype=jnp.float32) * 0.1
    b1 = jax.random.normal(k_b1, (H,), dtype=jnp.float32) * 0.1
    w2 = jax.random.normal(k_w2, (F if False else H, C), dtype=jnp.float32) * 0.1
    b2 = jax.random.normal(k_b2, (C,), dtype=jnp.float32) * 0.1

    # tb=1 -> 2-step grid so the pipelined/parallel path is exercised even at
    # the toy batch size.
    out = net_head(y_dsc, w1, b1, w2, b2, tb=1)
    out = jax.block_until_ready(out)

    ref = net_head_ref(y_dsc, w1, b1, w2, b2)
    assert out.shape == (B, C)
    assert jnp.allclose(out, ref, rtol=1e-4, atol=1e-4), "mismatch vs reference"

    print("KERNEL_OK")
</pallas_src>

<mosaic_0001>
module attributes {stable_mosaic.version = 11 : i64} {
  func.func @sigmoid_mean_kernel(%arg0: i32, %arg1: memref<1x8x15xbf16, #tpu.memory_space<vmem>>, %arg2: memref<1x1x15xf32, #tpu.memory_space<vmem>>) attributes {dimension_semantics = [#tpu.dimension_semantics<parallel>], iteration_bounds = array<i64: 2>, scalar_prefetch = 0 : i64, scratch_operands = 0 : i64, tpu.core_type = #tpu.core_type<tc>, window_params = [{transform_indices = @transform_0, window_bounds = array<i64: 1, 8, 15>}, {transform_indices = @transform_1, window_bounds = array<i64: 1, 1, 15>}]} {
    %c0 = arith.constant 0 : index
    %c0_0 = arith.constant 0 : index
    %c0_1 = arith.constant 0 : index
    %0 = vector.load %arg1[%c0, %c0_0, %c0_1] : memref<1x8x15xbf16, #tpu.memory_space<vmem>>, vector<1x8x15xbf16>
    %1 = arith.extf %0 : vector<1x8x15xbf16> to vector<1x8x15xf32>
    %cst = arith.constant 5.000000e-01 : f32
    %2 = vector.broadcast %cst : f32 to vector<1x8x15xf32>
    %3 = arith.mulf %2, %1 : vector<1x8x15xf32>
    %4 = math.tanh %3 : vector<1x8x15xf32>
    %cst_2 = arith.constant 5.000000e-01 : f32
    %5 = vector.broadcast %cst_2 : f32 to vector<1x8x15xf32>
    %6 = arith.mulf %5, %4 : vector<1x8x15xf32>
    %cst_3 = arith.constant 5.000000e-01 : f32
    %7 = vector.broadcast %cst_3 : f32 to vector<1x8x15xf32>
    %8 = arith.addf %6, %7 : vector<1x8x15xf32>
    %cst_4 = arith.constant dense<0.000000e+00> : vector<1x15xf32>
    %9 = vector.multi_reduction <add>, %8, %cst_4 [1] : vector<1x8x15xf32> to vector<1x15xf32>
    %10 = vector.shape_cast %9 : vector<1x15xf32> to vector<1x1x15xf32>
    %cst_5 = arith.constant 1.250000e-01 : f32
    %11 = vector.broadcast %cst_5 : f32 to vector<1x1x15xf32>
    %12 = arith.mulf %10, %11 : vector<1x1x15xf32>
    %c0_6 = arith.constant 0 : index
    %c0_7 = arith.constant 0 : index
    %c0_8 = arith.constant 0 : index
    %13 = vector.load %arg2[%c0_6, %c0_7, %c0_8] : memref<1x1x15xf32, #tpu.memory_space<vmem>>, vector<1x1x15xf32>
    tpu.vector_store %arg2[%c0_6, %c0_7, %c0_8], %12 {strides = array<i32>} : memref<1x1x15xf32, #tpu.memory_space<vmem>>, vector<1x1x15xf32>,
    return
  }
  func.func @transform_0(%arg0: i32) -> (i32, i32, i32) {
    %c0_i32 = arith.constant 0 : i32
    %c0_i32_0 = arith.constant 0 : i32
    %c0_i32_1 = arith.constant 0 : i32
    return %arg0, %c0_i32, %c0_i32_0 : i32, i32, i32
  }
  func.func @transform_1(%arg0: i32) -> (i32, i32, i32) {
    %c0_i32 = arith.constant 0 : i32
    %c0_i32_0 = arith.constant 0 : i32
    %c0_i32_1 = arith.constant 0 : i32
    return %arg0, %c0_i32, %c0_i32_0 : i32, i32, i32
  }
}

</mosaic_0001>

<bundles_post_ra>
// kernel: tpu_custom_call.1
= control target key start
LH: loop header
LB: loop body
LE: loop exit
PB: predicated region body
PF: predicated region fallthrough
CT: control target
= control target key end

     0   :  { %6 = vsyncpa [#allocation3], 0  ;;  %s522_s0 = inlined_call_operand.hbm [shape: bf16[2,8,15], index: 0, kind: input, shape index: {}]   ;;  %s523_s1 = inlined_call_operand.hbm [shape: f32[2,1,15], index: 1, kind: output, shape index: {}]  }
   0x1   :  { %8 = vsyncpa [#allocation3 + $0x1], 0 }
   0x2   :  { %9 = vsyncpa [#allocation4], 0 }
   0x3   :  { %11 = vsyncpa [#allocation4 + $0x1], 0  ;;  %s394_s6 = smov 0   ;;  %s396_s7 = smov 0  }
   0x4   :  { %s398_s8 = smov 0   ;;  %s400_s9 = smov 0  }
   0x5 LB: > { %s415_s10 = sadd.s32 4294967295, %s382_s9   ;;  %s229_s11 = sadd.s32 4294967294, %s382_s9   ;;  %s382_s9 = sphi %s400_s9, %s533_s9   ;;  %s378_s8 = sphi %s398_s8, %s532_s8   ;;  %s374_s7 = sphi %s396_s7, %s531_s7   ;;  %s370_s6 = sphi %s394_s6, %s530_s6  }
   0x6   : > { %s419_s12 = sadd.s32 1, %s382_s9   ;;  %s24_s13 = sadd.s32 1, %s378_s8 }
   0x7   : > { %s21_s14 = ssub.s32 %s382_s9, %s419_s12  ;;  %p31_p0 = scmp.ne.s32.totalorder %s378_s8, %s374_s7 }
   0x8   : > { %p22_p1 = scmp.eq.s32.totalorder %s21_s14, 0  ;;  %p32_p2 = scmp.eq.s32.totalorder %s382_s9, 0 }
   0x9   : > { %p37_p3 = scmp.ne.s32.totalorder %s374_s7, %s370_s6  ;;  %p38_p4 = scmp.eq.s32.totalorder %s415_s10, 0 }
   0xa   : > { %s431_s15 = scalar_select %p22_p1, %s378_s8, %s24_s13  }
   0xb   : > { %p433_p5 = por %p32_p2, %p31_p0  ;;  %p437_p6 = por %p38_p4, %p37_p3 }
   0xc   : > { %p61_p7 = scmp.eq.s32.totalorder %s415_s10, 1  ;;  %p67_p8 = scmp.eq.s32.totalorder %s229_s11, 1 }
   0xd   : > { %p250_p10 = scmp.lt.s32.totalorder %s382_s9, 2  ;;  %s87_s20 = sand.u32 1, %s378_s8  }
   0xe   : > { %p444_p11 = por %p61_p7, %p31_p0  ;;  %p448_p12 = por %p67_p8, %p37_p3 }
   0xf   : > { %s233_s21 = sshll.u32 %s382_s9, 2  ;;  %s232_s22 = sshll.u32 %s87_s20, 2 }
  0x10   : > { %s95_s25 = scalar_lea.hbm %s522_s0, %s233_s21  ;;  %s91_s27 = scalar_lea.vmem [#allocation2], %s232_s22 }
  0x11   : > { %s97_s26 = sshll.u32 %s95_s25, 4  ;;  %s99_s28 = sshll.u32 %s91_s27, 4  ;;  %s98_s26 = int_to_ptr.hbm [resolvable:$true] %s97_s26  ;;  %s100_s28 = int_to_ptr.vmem [resolvable:$true] %s99_s28 }
  0x12   : > { %p459_p13 = pnand %p250_p10, %p433_p5  ;;  %p234_p0 = scmp.ge.s32.totalorder %s382_s9, 1 }
  0x13   : > { %p104_p1 = scmp.lt.s32.totalorder %s382_s9, 3  ;;  %s88_s30 = scalar_lea.sflag [#allocation3], %s87_s20 }
  0x14   : > { %s286_s2 = sshra.s32 %s98_s26, 4  ;;  %p290_p3 = pneg %p459_p13  ;;  %s287_s2 = int_to_ptr.hbm [resolvable:$true] %s286_s2 }
  0x15   : > { %s288_s3 = scalar_lea.hbm %s287_s2, 4  ;;  %s293_s11 = scalar_lea.hbm %s522_s0, 8 }
  0x16   : > { %p289_p2 = scmp.ne.s32.totalorder %s287_s2, %s288_s3  ;;  %p294_p5 = scmp.lt.s32.totalorder %s287_s2, %s522_s0 }
  0x17   : > { %p295_p8 = scmp.lt.s32.totalorder %s293_s11, %s288_s3 }
  0x18   : > { %p291_p4 = pnand %p290_p3, %p289_p2 }
  0x19   : > { %p296_p10 = por %p295_p8, %p294_p5 }
  0x1a   : > { %p292_p7 = pneg %p291_p4 }
  0x1c   : > { %p297_p9 = pnand %p296_p10, %p292_p7 }
  0x1e   : > { %300 = shalt.err (!%p297_p9)
}
  0x1f   : > { %245 = dma.hbm_to_vmem [thread:$0]  (!%p459_p13), %s98_s26, 64, %s100_s28, %s88_s30  }
  0x20   : > { %p105_p2 = pnand %p234_p0, %p104_p1 }
  0x21   : > { %s480_s16 = sand.u32 (!%p105_p2), 1, %s374_s7  }
  0x22   : > { %108 = sbr.rel (%p105_p2) target bundleno = 74 (0x4a), region = 24  ;;  %s235_s20 = sshll.u32 (!%p105_p2), %s480_s16, 2 }
  0x23   : > { %s111_s21 = scalar_lea.sflag (!%p105_p2), [#allocation3], %s480_s16  ;;  %s114_s22 = scalar_lea.vmem (!%p105_p2), [#allocation2], %s235_s20 }
  0x27   : > { %361 = dma.done.wait (%p437_p6), %s111_s21, 64  }
  0x28   : > { %363 = vsyncadd (%p437_p6), %s111_s21, 4294967232  ;;  %v133_v0 = vld [vmem:[%s114_s22] sm:$0xf]  ;;  %vm139_vm0 = vcmask 121856   ;;  %s159_s17 = scalar_lea.hbm %s523_s1, %s415_s10  ;;  %s132_s25 = scalar_lea.vmem [#allocation5], %s480_s16  ;;  %vm148_vm1 = vcmask 114688  }
  0x29   : > { %v134_v1 = vunpack.c.l.bf16 %v133_v0  ;;  %s161_s26 = sshll.u32 %s132_s25, 4  ;;  %s163_s27 = sshll.u32 %s159_s17, 4  ;;  %s162_s26 = int_to_ptr.vmem [resolvable:$true] %s161_s26  ;;  %s164_s27 = int_to_ptr.hbm [resolvable:$true] %s163_s27 }
  0x2a   : > { %s151_s28 = scalar_lea.sflag [#allocation4], %s480_s16  ;;  %s330_s29 = sshra.s32 %s164_s27, 4  ;;  %s331_s29 = int_to_ptr.hbm [resolvable:$true] %s330_s29 }
  0x2b   : > { %v135_v2 = vmul.f32 0.5, %v134_v1  ;;  %s332_s30 = scalar_lea.hbm %s331_s29, 1  ;;  %s336_s3 = scalar_lea.hbm %s523_s1, 2 }
  0x2c   : > { %p333_p6 = scmp.ne.s32.totalorder %s331_s29, %s332_s30  ;;  %p337_p0 = scmp.lt.s32.totalorder %s331_s29, %s523_s1 }
  0x2d   : > { %284 = vtanh.f32 %v135_v2  ;;  %p338_p1 = scmp.lt.s32.totalorder %s336_s3, %s332_s30 }
  0x2e   : > { %p334_p9 = pnand %p333_p6, %p444_p11 }
  0x2f   : > { %p339_p3 = por %p338_p1, %p337_p0 }
  0x30   : > { %p335_p13 = pneg %p334_p9 }
  0x32   : > { %p340_p4 = pnand %p339_p3, %p335_p13 }
  0x33   : > { %v285_v3 = vpop.eup %284 }
  0x34   : > { %v137_v4 = vmul.f32 0.5, %v285_v3 }
  0x36   : > { %v138_v5 = vadd.f32 0.5, %v137_v4 }
  0x38   : > { %v140_v6 = vsel %vm139_vm0, %v138_v5, 0.0 }
  0x39   : > { %v141_v7 = vrot.slane %v140_v6, 4 }
  0x3b   : > { %v142_v8 = vadd.f32 %v141_v7, %v140_v6 }
  0x3d   : > { %v143_v9 = vrot.slane %v142_v8, 2 }
  0x3f   : > { %v144_v10 = vadd.f32 %v143_v9, %v142_v8 }
  0x41   : > { %v145_v11 = vrot.slane %v144_v10, 1 }
  0x43   : > { %v146_v12 = vadd.f32 %v145_v11, %v144_v10 }
  0x45   : > { %v147_v13 = vmul.f32 0.125, %v146_v12 }
  0x47   : > { %149 = vst.msk [vmem:[%s132_s25] sm:$0x1] %vm148_vm1, %v147_v13 }
  0x48   : > { %343 = shalt.err (!%p340_p4)
}
  0x49   : > { %240 = dma.vmem_to_hbm [thread:$0]  (%p444_p11), %s162_s26, 16, %s164_s27, %s151_s28  }
  0x4a PF: > { %s175_s11 = sand.u32 1, %s370_s6   ;;  %p529_p7 = scmp.ge.s32.totalorder %s382_s9, 2 }
  0x4b   : > { %s176_s13 = scalar_lea.sflag [#allocation4], %s175_s11 }
  0x4c   : > { %p247_p5 = pnand %p529_p7, %p448_p12 }
  0x4e   : > { %p248_p8 = pneg %p247_p5 }
  0x50   : > { %365 = dma.done.wait (%p248_p8), %s176_s13, 16  }
  0x51   : > { %367 = vsyncadd (%p248_p8), %s176_s13, 4294967280  ;;  %p14_p10 = scmp.ge.s32.totalorder %s419_s12, 4   ;;  %s530_s6 = smov %s374_s7 }
  0x52   : > { %s531_s7 = smov %s378_s8  ;;  %s532_s8 = smov %s431_s15 }
  0x53   : > { %s533_s9 = smov %s419_s12  ;;  %16 = sbr.rel (!%p14_p10) target bundleno = 5 (0x5), region = 69 }
  0x58   :  { %181 = vsyncpa [#allocation3], 1 }
  0x59   :  { %183 = vsyncpa [#allocation3 + $0x1], 1 }
  0x5a   :  { %184 = vsyncpa [#allocation4], 1 }
  0x5b   :  { %186 = vsyncpa [#allocation4 + $0x1], 1 }

</bundles_post_ra>
